<compile_context>
chip_gen: v6e
topology: v6e:2x2x1
jax: 0.10.0
libtpu: 0.0.40
codegen_flags: <defaults>
</compile_context>

<pallas_src>
import jax
import jax.numpy as jnp
from jax.experimental import pallas as pl
from jax.experimental.pallas import tpu as pltpu


def _silu(z):
    # z * sigmoid(z) == 0.5 * z * (tanh(0.5*z) + 1): single EUP transcendental.
    return 0.5 * z * (jnp.tanh(0.5 * z) + 1.0)


def small_mlp_kernel(t_ref, x_ref, w1_ref, b1_ref, w2_ref, b2_ref,
                     w3r_ref, b3s_ref, o_ref):
    # ---- layer 1 on the VPU: broadcast FMAs instead of a degenerate K=2 MXU dot ----
    # h = [t, x] @ W1 + b1  ==  t*W1[0,:] + sum_f x[:,f]*W1[f+1,:] + b1
    z = t_ref[...] * w1_ref[0:1, :] + b1_ref[...]            # (TB, n_hid) f32
    n_feat = x_ref.shape[1]
    for f in range(n_feat):                                   # static unroll (n_feat=1)
        # NOTE: if n_feat ever grows past ~8-16, switch layer 1 back to a single
        # MXU dot over a concatenated (B, n_dims) input (VALU would saturate here).
        z = z + x_ref[:, f:f + 1] * w1_ref[f + 1:f + 2, :]
    z = _silu(z)

    # ---- layer 2: (TB, n_hid) @ (n_hid, n_hid) on the MXU, bf16 in / f32 accumulate ----
    z = jnp.dot(z.astype(jnp.bfloat16), w2_ref[...],
                preferred_element_type=jnp.float32) + b2_ref[...]
    z = _silu(z)

    # ---- layer 3 + keepdim row-sum folded: z @ (W3·1) + sum(b3), on VPU + XLU ----
    o_ref[...] = (jnp.sum(z * w3r_ref[...], axis=-1, keepdims=True)
                  + b3s_ref[0])


def small_mlp_forward(t, x, params, *, tb=None):
    w1, b1, w2, b2, w3, b3 = params
    B = x.shape[0]
    x_flat = x.reshape(B, -1)                 # x.view(B, -1)   (glue)
    t_col = t.reshape(B, 1)                   # t.view(B, 1)    (glue)
    n_feat = x_flat.shape[1]
    n_dims = n_feat + 1
    n_hid = w1.shape[1]

    # Exact algebraic fold of the final keepdim row-sum into layer 3:
    #   sum(z @ W3 + b3, -1) == z @ (W3·1) + sum(b3).
    # W3·1 is passed as a (1, n_hid) ROW so the epilogue runs on VPU+XLU, not the MXU.
    w3_row = jnp.sum(w3, axis=1).reshape(1, n_hid)            # (1, n_hid) f32
    b3_sum = jnp.sum(b3).reshape(1)                           # SMEM scalar

    # bf16 operands for the layer-2 MXU matmul; accumulation stays f32 in-kernel.
    w2_bf16 = w2.astype(jnp.bfloat16)

    if tb is None:
        if B <= 8:
            tb = B
        else:
            # >=2 grid steps so v7x's two TensorCores both get work under
            # dimension_semantics=("parallel",); tiles up to 1024 rows amortize
            # the ~0.35 us fixed cost per grid step (footprint ~1 MiB f32
            # activations + ~100 KiB weights -- far below any VMEM limit).
            tb = min(1024, pl.cdiv(B, 2))
            tb = max(8, (tb // 8) * 8)        # sublane multiple
    grid = (pl.cdiv(B, tb),)

    batch_spec = lambda cols: pl.BlockSpec((tb, cols), lambda i: (i, 0))
    const_spec = lambda shape: pl.BlockSpec(shape, lambda i: (0, 0))

    return pl.pallas_call(
        small_mlp_kernel,
        out_shape=jax.ShapeDtypeStruct((B, 1), jnp.float32),
        grid=grid,
        in_specs=[
            batch_spec(1),                    # t column          (tiled over batch)
            batch_spec(n_feat),               # flattened x       (tiled over batch)
            const_spec((n_dims, n_hid)),      # W1 (in, out)      VMEM-resident
            const_spec((1, n_hid)),           # b1
            const_spec((n_hid, n_hid)),       # W2 (bf16)
            const_spec((1, n_hid)),           # b2
            const_spec((1, n_hid)),           # W3·1 row
            pl.BlockSpec(memory_space=pltpu.MemorySpace.SMEM),   # sum(b3) scalar
        ],
        out_specs=batch_spec(1),
        compiler_params=pltpu.CompilerParams(
            dimension_semantics=("parallel",)),   # shards batch across TCs on v7x
    )(t_col, x_flat, w1, b1, w2_bf16, b2, w3_row, b3_sum)


def init_params(key, n_dims, n_hid, n_out):
    """Deterministic PyTorch-Linear-style init: U(-1/sqrt(fan_in), 1/sqrt(fan_in)).
    Weights stored transposed as (in, out) so the kernel computes h @ W + b."""
    ks = jax.random.split(key, 6)

    def lin(kw, kb, fan_in, fan_out):
        bound = 1.0 / jnp.sqrt(fan_in)
        w = jax.random.uniform(kw, (fan_in, fan_out), jnp.float32, -bound, bound)
        b = jax.random.uniform(kb, (1, fan_out), jnp.float32, -bound, bound)
        return w, b

    w1, b1 = lin(ks[0], ks[1], n_dims, n_hid)
    w2, b2 = lin(ks[2], ks[3], n_hid, n_hid)
    w3, b3 = lin(ks[4], ks[5], n_hid, n_out)
    return (w1, b1, w2, b2, w3, b3)


def reference_forward(t, x, params):
    """Pure-JAX f32 reference mirroring the PyTorch module exactly (unfolded)."""
    w1, b1, w2, b2, w3, b3 = params
    B = x.shape[0]
    h = jnp.concatenate([t.reshape(B, 1), x.reshape(B, -1)], axis=1)
    h = jax.nn.silu(h @ w1 + b1)
    h = jax.nn.silu(h @ w2 + b2)
    h = h @ w3 + b3
    return jnp.sum(h, axis=1, keepdims=True)


if __name__ == "__main__":
    # Small, TPU-friendly sizes consistent with the module defaults
    # (n_dims=2 -> x flattens to 1 feature + the t column; n_hid=128; n_out=100).
    B, n_dims, n_hid, n_out = 8, 2, 128, 100

    key = jax.random.PRNGKey(0)
    k_t, k_x, k_p = jax.random.split(key, 3)
    t = jax.random.normal(k_t, (B,), jnp.float32)
    x = jax.random.normal(k_x, (B, n_dims - 1), jnp.float32)
    params = init_params(k_p, n_dims, n_hid, n_out)

    out = jax.block_until_ready(small_mlp_forward(t, x, params))
    ref = reference_forward(t, x, params)

    assert out.shape == (B, 1), out.shape
    # bf16 MXU operands for layer 2 -> expect ~1e-2-level relative error vs f32 ref.
    assert jnp.allclose(out, ref, atol=1e-1, rtol=2e-2), (out, ref)

    print("KERNEL_OK")
</pallas_src>

<mosaic_0001>
module attributes {stable_mosaic.version = 11 : i64} {
  func.func @small_mlp_kernel(%arg0: i32, %arg1: memref<8x1xf32, #tpu.memory_space<vmem>>, %arg2: memref<8x1xf32, #tpu.memory_space<vmem>>, %arg3: memref<2x128xf32, #tpu.memory_space<vmem>>, %arg4: memref<1x128xf32, #tpu.memory_space<vmem>>, %arg5: memref<128x128xbf16, #tpu.memory_space<vmem>>, %arg6: memref<1x128xf32, #tpu.memory_space<vmem>>, %arg7: memref<1x128xf32, #tpu.memory_space<vmem>>, %arg8: memref<1xf32, #tpu.memory_space<smem>>, %arg9: memref<8x1xf32, #tpu.memory_space<vmem>>) attributes {dimension_semantics = [#tpu.dimension_semantics<parallel>], iteration_bounds = array<i64: 1>, scalar_prefetch = 0 : i64, scratch_operands = 0 : i64, tpu.core_type = #tpu.core_type<tc>, window_params = [{transform_indices = @transform_0, window_bounds = array<i64: 8, 1>}, {transform_indices = @transform_1, window_bounds = array<i64: 8, 1>}, {pipeline_mode = #tpu.pipeline_mode<synchronous>, transform_indices = @transform_2, window_bounds = array<i64: 2, 128>}, {pipeline_mode = #tpu.pipeline_mode<synchronous>, transform_indices = @transform_3, window_bounds = array<i64: 1, 128>}, {pipeline_mode = #tpu.pipeline_mode<synchronous>, transform_indices = @transform_4, window_bounds = array<i64: 128, 128>}, {pipeline_mode = #tpu.pipeline_mode<synchronous>, transform_indices = @transform_5, window_bounds = array<i64: 1, 128>}, {pipeline_mode = #tpu.pipeline_mode<synchronous>, transform_indices = @transform_6, window_bounds = array<i64: 1, 128>}, {transform_indices = @transform_7, window_bounds = array<i64: 1>}, {transform_indices = @transform_8, window_bounds = array<i64: 8, 1>}]} {
    %c0 = arith.constant 0 : index
    %c0_0 = arith.constant 0 : index
    %0 = vector.load %arg1[%c0, %c0_0] : memref<8x1xf32, #tpu.memory_space<vmem>>, vector<8x1xf32>
    %c0_1 = arith.constant 0 : index
    %c0_2 = arith.constant 0 : index
    %1 = vector.load %arg3[%c0_1, %c0_2] : memref<2x128xf32, #tpu.memory_space<vmem>>, vector<1x128xf32>
    %2 = vector.broadcast %0 : vector<8x1xf32> to vector<8x128xf32>
    %3 = vector.broadcast %1 : vector<1x128xf32> to vector<8x128xf32>
    %4 = arith.mulf %2, %3 : vector<8x128xf32>
    %c0_3 = arith.constant 0 : index
    %c0_4 = arith.constant 0 : index
    %5 = vector.load %arg4[%c0_3, %c0_4] : memref<1x128xf32, #tpu.memory_space<vmem>>, vector<1x128xf32>
    %6 = vector.broadcast %5 : vector<1x128xf32> to vector<8x128xf32>
    %7 = arith.addf %4, %6 : vector<8x128xf32>
    %c0_5 = arith.constant 0 : index
    %c0_6 = arith.constant 0 : index
    %8 = vector.load %arg2[%c0_5, %c0_6] : memref<8x1xf32, #tpu.memory_space<vmem>>, vector<8x1xf32>
    %c1 = arith.constant 1 : index
    %c0_7 = arith.constant 0 : index
    %9 = vector.load %arg3[%c1, %c0_7] : memref<2x128xf32, #tpu.memory_space<vmem>>, vector<1x128xf32>
    %10 = vector.broadcast %8 : vector<8x1xf32> to vector<8x128xf32>
    %11 = vector.broadcast %9 : vector<1x128xf32> to vector<8x128xf32>
    %12 = arith.mulf %10, %11 : vector<8x128xf32>
    %13 = arith.addf %7, %12 : vector<8x128xf32>
    %cst = arith.constant 5.000000e-01 : f32
    %14 = vector.broadcast %cst : f32 to vector<8x128xf32>
    %15 = arith.mulf %14, %13 : vector<8x128xf32>
    %cst_8 = arith.constant 5.000000e-01 : f32
    %16 = vector.broadcast %cst_8 : f32 to vector<8x128xf32>
    %17 = arith.mulf %16, %13 : vector<8x128xf32>
    %18 = math.tanh %17 : vector<8x128xf32>
    %cst_9 = arith.constant 1.000000e+00 : f32
    %19 = vector.broadcast %cst_9 : f32 to vector<8x128xf32>
    %20 = arith.addf %18, %19 : vector<8x128xf32>
    %21 = arith.mulf %15, %20 : vector<8x128xf32>
    %22 = arith.truncf %21 : vector<8x128xf32> to vector<8x128xbf16>
    %c0_10 = arith.constant 0 : index
    %c0_11 = arith.constant 0 : index
    %23 = vector.load %arg5[%c0_10, %c0_11] : memref<128x128xbf16, #tpu.memory_space<vmem>>, vector<128x128xbf16>
    %cst_12 = arith.constant dense<0.000000e+00> : vector<8x128xf32>
    %24 = tpu.matmul %22, %23, %cst_12 {dimension_numbers = #tpu.dot_dimension_numbers<[1], [0], [0], [1], [0, 0, 1, 1], [], []>} : vector<8x128xbf16>, vector<128x128xbf16>, vector<8x128xf32> -> vector<8x128xf32>
    %c0_13 = arith.constant 0 : index
    %c0_14 = arith.constant 0 : index
    %25 = vector.load %arg6[%c0_13, %c0_14] : memref<1x128xf32, #tpu.memory_space<vmem>>, vector<1x128xf32>
    %26 = vector.broadcast %25 : vector<1x128xf32> to vector<8x128xf32>
    %27 = arith.addf %24, %26 : vector<8x128xf32>
    %cst_15 = arith.constant 5.000000e-01 : f32
    %28 = vector.broadcast %cst_15 : f32 to vector<8x128xf32>
    %29 = arith.mulf %28, %27 : vector<8x128xf32>
    %cst_16 = arith.constant 5.000000e-01 : f32
    %30 = vector.broadcast %cst_16 : f32 to vector<8x128xf32>
    %31 = arith.mulf %30, %27 : vector<8x128xf32>
    %32 = math.tanh %31 : vector<8x128xf32>
    %cst_17 = arith.constant 1.000000e+00 : f32
    %33 = vector.broadcast %cst_17 : f32 to vector<8x128xf32>
    %34 = arith.addf %32, %33 : vector<8x128xf32>
    %35 = arith.mulf %29, %34 : vector<8x128xf32>
    %c0_18 = arith.constant 0 : index
    %c0_19 = arith.constant 0 : index
    %36 = vector.load %arg7[%c0_18, %c0_19] : memref<1x128xf32, #tpu.memory_space<vmem>>, vector<1x128xf32>
    %37 = vector.broadcast %36 : vector<1x128xf32> to vector<8x128xf32>
    %38 = arith.mulf %35, %37 : vector<8x128xf32>
    %cst_20 = arith.constant dense<0.000000e+00> : vector<8xf32>
    %39 = vector.multi_reduction <add>, %38, %cst_20 [1] : vector<8x128xf32> to vector<8xf32>
    %40 = vector.shape_cast %39 : vector<8xf32> to vector<8x1xf32>
    %c0_21 = arith.constant 0 : index
    %41 = memref.load %arg8[%c0_21] : memref<1xf32, #tpu.memory_space<smem>>
    %42 = vector.broadcast %41 : f32 to vector<8x1xf32>
    %43 = arith.addf %40, %42 : vector<8x1xf32>
    %c0_22 = arith.constant 0 : index
    %c0_23 = arith.constant 0 : index
    %44 = vector.load %arg9[%c0_22, %c0_23] : memref<8x1xf32, #tpu.memory_space<vmem>>, vector<8x1xf32>
    tpu.vector_store %arg9[%c0_22, %c0_23], %43 {strides = array<i32>} : memref<8x1xf32, #tpu.memory_space<vmem>>, vector<8x1xf32>,
    return
  }
  func.func @transform_0(%arg0: i32) -> (i32, i32) {
    %c0_i32 = arith.constant 0 : i32
    %c0_i32_0 = arith.constant 0 : i32
    return %arg0, %c0_i32 : i32, i32
  }
  func.func @transform_1(%arg0: i32) -> (i32, i32) {
    %c0_i32 = arith.constant 0 : i32
    %c0_i32_0 = arith.constant 0 : i32
    return %arg0, %c0_i32 : i32, i32
  }
  func.func @transform_2(%arg0: i32) -> (i32, i32) {
    %c0_i32 = arith.constant 0 : i32
    %c0_i32_0 = arith.constant 0 : i32
    %c0_i32_1 = arith.constant 0 : i32
    return %c0_i32, %c0_i32_0 : i32, i32
  }
  func.func @transform_3(%arg0: i32) -> (i32, i32) {
    %c0_i32 = arith.constant 0 : i32
    %c0_i32_0 = arith.constant 0 : i32
    %c0_i32_1 = arith.constant 0 : i32
    return %c0_i32, %c0_i32_0 : i32, i32
  }
  func.func @transform_4(%arg0: i32) -> (i32, i32) {
    %c0_i32 = arith.constant 0 : i32
    %c0_i32_0 = arith.constant 0 : i32
    %c0_i32_1 = arith.constant 0 : i32
    return %c0_i32, %c0_i32_0 : i32, i32
  }
  func.func @transform_5(%arg0: i32) -> (i32, i32) {
    %c0_i32 = arith.constant 0 : i32
    %c0_i32_0 = arith.constant 0 : i32
    %c0_i32_1 = arith.constant 0 : i32
    return %c0_i32, %c0_i32_0 : i32, i32
  }
  func.func @transform_6(%arg0: i32) -> (i32, i32) {
    %c0_i32 = arith.constant 0 : i32
    %c0_i32_0 = arith.constant 0 : i32
    %c0_i32_1 = arith.constant 0 : i32
    return %c0_i32, %c0_i32_0 : i32, i32
  }
  func.func @transform_7(%arg0: i32) -> i32 {
    %c0_i32 = arith.constant 0 : i32
    %c0_i32_0 = arith.constant 0 : i32
    return %c0_i32 : i32
  }
  func.func @transform_8(%arg0: i32) -> (i32, i32) {
    %c0_i32 = arith.constant 0 : i32
    %c0_i32_0 = arith.constant 0 : i32
    return %arg0, %c0_i32 : i32, i32
  }
}

</mosaic_0001>

<bundles_post_ra>
// kernel: tpu_custom_call.1
= control target key start
LH: loop header
LB: loop body
LE: loop exit
PB: predicated region body
PF: predicated region fallthrough
CT: control target
= control target key end

     0   :  { %14 = vsyncpa [#allocation4], 0  ;;  %s301_s27 = smov [#allocation3]   ;;  %s382_s0 = inlined_call_operand.vmem [shape: f32[8,1], index: 0, kind: input, shape index: {}]   ;;  %s383_s1 = inlined_call_operand.vmem [shape: f32[8,1], index: 1, kind: input, shape index: {}]   ;;  %s384_s2 = inlined_call_operand.vmem [shape: f32[2,128], index: 2, kind: input, shape index: {}]   ;;  %s385_s3 = inlined_call_operand.vmem [shape: f32[1,128], index: 3, kind: input, shape index: {}]   ;;  %s386_s4 = inlined_call_operand.hbm [shape: bf16[128,128], index: 4, kind: input, shape index: {}]   ;;  %s387_s5 = inlined_call_operand.vmem [shape: f32[1,128], index: 5, kind: input, shape index: {}]   ;;  %s388_s6 = inlined_call_operand.vmem [shape: f32[1,128], index: 6, kind: input, shape index: {}]   ;;  %s389_s7 = inlined_call_operand.<no memory space> [shape: f32[1], index: 7, kind: input, shape index: {}]   ;;  %s390_s8 = inlined_call_operand.vmem [shape: f32[8,1], index: 8, kind: output, shape index: {}]  }
   0x1   :  { %s28_s28 = sshll.u32 %s301_s27, 4  ;;  %s29_s28 = int_to_ptr.vmem [resolvable:$true] %s28_s28 }
   0x2   :  { %s287_s29 = scalar_lea.vmem %s29_s28, 1024  ;;  %p292_p1 = scmp.lt.s32.totalorder %s29_s28, %s29_s28 }
   0x3   :  { %p288_p0 = scmp.ne.s32.totalorder %s29_s28, %s287_s29  ;;  %p293_p2 = scmp.lt.s32.totalorder %s287_s29, %s287_s29 }
   0x5   :  { %p294_p3 = por %p293_p2, %p292_p1 }
   0x7   :  { %p295_p4 = pnand %p294_p3, %p288_p0 }
   0x9   :  { %298 = shalt.err (!%p295_p4)
}
   0xa   :  { %s302_s30 = smov 64   ;;  %s303_s9 = smov 4  }
   0xb   :  { %34 = dma.hbm_to_vmem [thread:$0]  %s386_s4, 1024, %s29_s28, [#allocation4], %s302_s30, %s302_s30, %s303_s9  }
   0xc   :  { %299 = dma.done.wait [#allocation4], 1024  }
   0xd   :  { %300 = vsyncadd [#allocation4], 4294966272  ;;  %v304_v0 = vmov 0   ;;  %v305_v1 = vmov 0.0   ;;  %v45_v2 = vld [vmem:[%s382_s0] sm:$0xff]  ;;  %v267_v3 = vld [vmem:[#allocation3 + $0x38] sm:$0xff]   ;;  %v209_v38 = vstv %s389_s7 }
   0xe   :  { %266 = vset.pattern.permute.xlu0 %v304_v0  ;;  %240 = vmatprep.subr.bf16.mxu0 %v305_v1  ;;  %v65_v4 = vld [vmem:[%s383_s1] sm:$0xff]  ;;  %v268_v5 = vld [vmem:[#allocation3 + $0x30] sm:$0xff]   ;;  %v269_v6 = vld [vmem:[#allocation3 + $0x28] sm:$0xff]   ;;  %vm306_vm0 = vmmov 0   ;;  %vm211_vm1 = vcmask 7168  }
   0xf   :  { %49 = vperm.xlu0 %266, %v45_v2   ;;  %241 = vmatpush3.bf16.msra.mxu0 %v267_v3  ;;  %v270_v7 = vld [vmem:[#allocation3 + $0x20] sm:$0xff]   ;;  %v271_v8 = vld [vmem:[#allocation3 + $0x18] sm:$0xff]   ;;  %v272_v9 = vld [vmem:[#allocation3 + $0x10] sm:$0xff]  }
  0x10   :  { %242 = vmatprep.subr.bf16.mxu0 %v305_v1  ;;  %256 = vmatprep.mubr.msk.bf16.mxu0 %vm306_vm0, %v305_v1  ;;  %v273_v10 = vld [vmem:[#allocation3 + $0x8] sm:$0xff]   ;;  %v274_v11 = vld [vmem:[#allocation3] sm:$0xff]  }
  0x11   :  { %v218_v12 = vld [vmem:[%s384_s2] ss:$0 sm:$0xff]  ;;  %v220_v16 = vld [vmem:[%s384_s2 + $0x1] ss:$0 sm:$0xff] }
  0x12   :  { %v219_v15 = vld [vmem:[%s385_s3] ss:$0 sm:$0xff] }
  0x13   :  { %69 = vperm.xlu0 %266, %v65_v4   ;;  %243 = vmatpush3.bf16.msra.mxu0 %v268_v5  ;;  %v221_v26 = vld [vmem:[%s387_s5] ss:$0 sm:$0xff] }
  0x14   :  { %244 = vmatprep.subr.bf16.mxu0 %v305_v1  ;;  %v230_v35 = vld [vmem:[%s388_s6] ss:$0 sm:$0xff] }
  0x17   :  { %245 = vmatpush3.bf16.msra.mxu0 %v269_v6 }
  0x18   :  { %246 = vmatprep.subr.bf16.mxu0 %v305_v1 }
  0x1b   :  { %247 = vmatpush3.bf16.msra.mxu0 %v270_v7 }
  0x1c   :  { %248 = vmatprep.subr.bf16.mxu0 %v305_v1 }
  0x1f   :  { %249 = vmatpush3.bf16.msra.mxu0 %v271_v8 }
  0x20   :  { %250 = vmatprep.subr.bf16.mxu0 %v305_v1 }
  0x23   :  { %251 = vmatpush3.bf16.msra.mxu0 %v272_v9 }
  0x24   :  { %252 = vmatprep.subr.bf16.mxu0 %v305_v1 }
  0x27   :  { %253 = vmatpush3.bf16.msra.mxu0 %v273_v10 }
  0x28   :  { %254 = vmatprep.subr.bf16.mxu0 %v305_v1 }
  0x2b   :  { %255 = vmatpush3.bf16.msra.mxu0 %v274_v11 }
  0x8a   :  { %v50_v13 = vpop.permute.xlu0 %49 }
  0x8b   :  { %v56_v14 = vmul.f32 %v218_v12, %v50_v13 }
  0x8d   :  { %v64_v18 = vadd.f32 %v219_v15, %v56_v14 }
  0x8e   :  { %v70_v17 = vpop.permute.xlu0 %69 }
  0x8f   :  { %v76_v19 = vmul.f32 %v220_v16, %v70_v17 }
  0x91   :  { %v77_v20 = vadd.f32 %v76_v19, %v64_v18 }
  0x93   :  { %v78_v21 = vmul.f32 0.5, %v77_v20 }
  0x95   :  { %275 = vtanh.f32 %v78_v21 }
  0xa2   :  { %v276_v22 = vpop.eup %275 }
  0xa3   :  { %v80_v23 = vadd.f32 1.0, %v276_v22 }
  0xa5   :  { %v81_v24 = vmul.f32 %v80_v23, %v78_v21 }
  0xa7   :  { %v82_v25 = vpack.c.bf16 %v81_v24, %v81_v24 }
  0xa9   :  { %257 = vmatmul.mubr.bf16.vlgmr.msra.gmra.mxu0 %v82_v25 }
 0x169   :  { %v188_v27 = vpop.f32.mrf.mxu0 }
 0x16a   :  { %v189_v28 = vadd.f32 %v221_v26, %v188_v27 }
 0x16b   :  { %v258_v29 = vpop.f32.mrf.mxu0 }
 0x16c   :  { %v194_v30 = vmul.f32 0.5, %v189_v28 }
 0x16d   :  { %v191_v31 = vpop.f32.mrf.mxu0 }
 0x16e   :  { %277 = vtanh.f32 %v194_v30 }
 0x16f   :  { %v259_v32 = vpop.f32.mrf.mxu0 }
 0x17b   :  { %v278_v33 = vpop.eup %277 }
 0x17c   :  { %v196_v34 = vadd.f32 1.0, %v278_v33 }
 0x17e   :  { %v197_v36 = vmul.f32 %v196_v34, %v194_v30 }
 0x180   :  { %v205_v37 = vmul.f32 %v230_v35, %v197_v36 }
 0x182   :  { %206 = vadd.xlane.f32.xlu1 %v205_v37 }
 0x20b   :  { %v207_v39 = vpop.xlane.xlu1 %206 }
 0x20c   :  { %v210_v40 = vadd.f32 %v209_v38, %v207_v39 }
 0x20e   :  { %212 = vst.msk [vmem:[%s390_s8] sm:$0xff] %vm211_vm1, %v210_v40 }
 0x20f   :  { %217 = vsyncpa [#allocation4], 1 }

</bundles_post_ra>
